<compile_context>
chip_gen: v6e
topology: v6e:2x2x1
jax: 0.10.0
libtpu: 0.0.40
codegen_flags: <defaults>
</compile_context>

<pallas_src>
import functools

import jax
import jax.numpy as jnp
from jax import lax
from jax.experimental import pallas as pl
from jax.experimental.pallas import tpu as pltpu


def _round_up(x, m):
    return ((x + m - 1) // m) * m


def _row_block_body(temperature, n_valid, pos_base, a_rows_ref, a_full_ref, out_ref):
    """Shared per-row-block loss computation.

    pos_base:   [tm, Np] f32 "same class" base mask (diag / padding NOT yet removed)
    a_rows_ref: [tm, Np? no -> tm, D] anchor rows (bf16/f32)
    a_full_ref: [Np, D]  full contrast matrix (bf16/f32), resident across grid
    out_ref:    [tm, 1]  f32 per-row loss (-mean_log_prob_pos), 0 for padded rows
    """
    a_rows = a_rows_ref[...]                 # [tm, D]
    a_full = a_full_ref[...]                 # [Np, D]
    tm = a_rows.shape[0]
    n_pad = a_full.shape[0]
    r0 = pl.program_id(0) * tm

    # anchor_dot_contrast for this row block: NT matmul (contract last dims),
    # bf16 operands -> f32 accumulation on the MXU, no transpose copy.
    s = lax.dot_general(
        a_rows, a_full,
        dimension_numbers=(((1,), (1,)), ((), ())),
        preferred_element_type=jnp.float32) * (1.0 / temperature)   # [tm, Np]

    col = lax.broadcasted_iota(jnp.int32, (tm, n_pad), 1)
    row = lax.broadcasted_iota(jnp.int32, (tm, n_pad), 0) + r0
    valid_col = col < n_valid                          # drop padded columns
    contrast_ok = jnp.logical_and(valid_col, row != col)   # also drop self-contrast

    # Numerical stabilization (shift-invariant; matches torch's row-max subtract).
    row_max = jnp.max(jnp.where(valid_col, s, -1e30), axis=1, keepdims=True)
    logits = s - row_max                               # [tm, Np]

    # Softmax denominator over non-self, non-padded columns (diag mask folded
    # straight into the where -> no separate logits_mask array).
    exp_l = jnp.where(contrast_ok, jnp.exp(logits), 0.0)
    log_denom = jnp.log(jnp.sum(exp_l, axis=1, keepdims=True))   # [tm, 1]

    # Positives = base mask with self-contrast / padding removed.
    pos = pos_base * jnp.where(contrast_ok, 1.0, 0.0)            # [tm, Np]
    pos_count = jnp.sum(pos, axis=1, keepdims=True)              # [tm, 1]
    pos_logit_sum = jnp.sum(pos * logits, axis=1, keepdims=True) # [tm, 1]

    # mean_log_prob_pos = sum(pos * (logits - log_denom)) / sum(pos)
    #  (log_prob never materialized as a [tm, Np] array)
    mean_log_prob_pos = (pos_logit_sum - log_denom * pos_count) / pos_count

    row_id = lax.broadcasted_iota(jnp.int32, (tm, 1), 0) + r0
    out_ref[...] = jnp.where(row_id < n_valid, -mean_log_prob_pos, 0.0)


def _supcon_labels_kernel(temperature, n_valid,
                          lab_row_ref, lab_col_ref, a_rows_ref, a_full_ref, out_ref):
    # lab_row_ref: [tm, 1] int32 (this block's row labels)
    # lab_col_ref: [1, Np] int32 (all labels, resident)
    lab_eq = lab_row_ref[...] == lab_col_ref[...]      # [tm, Np] bool
    pos_base = jnp.where(lab_eq, 1.0, 0.0)
    _row_block_body(temperature, n_valid, pos_base, a_rows_ref, a_full_ref, out_ref)


def _supcon_mask_kernel(temperature, n_valid,
                        mask_rows_ref, a_rows_ref, a_full_ref, out_ref):
    # mask_rows_ref: [tm, Np] f32 row block of the tiled user mask (streamed).
    pos_base = mask_rows_ref[...].astype(jnp.float32)
    _row_block_body(temperature, n_valid, pos_base, a_rows_ref, a_full_ref, out_ref)


def supcon_loss(features, labels=None, mask=None, *, temperature=0.07,
                contrast_mode='all', compute_dtype=jnp.bfloat16, block_rows=128):
    """JAX/Pallas equivalent of SupConLoss.forward (contrast_mode='all')."""
    if features.ndim < 3:
        raise ValueError('`features` needs to be [bsz, n_views, ...]')
    if features.ndim > 3:
        features = features.reshape(features.shape[0], features.shape[1], -1)
    bsz, n_views, dim = features.shape

    if contrast_mode != 'all':
        # TODO(synk): contrast_mode='one' not wired up; 'all' matches default usage.
        raise ValueError('Only contrast_mode="all" is implemented')
    if labels is not None and mask is not None:
        raise ValueError('Cannot define both `labels` and `mask`')

    n = bsz * n_views
    # contrast_feature = cat(unbind(features, dim=1), dim=0) -> view-major rows.
    contrast = jnp.transpose(features, (1, 0, 2)).reshape(n, dim)
    contrast = contrast.astype(compute_dtype)          # bf16 feed for the MXU

    # Row-block size and padded row count (tm always a multiple of 8).
    tm = block_rows if n >= block_rows else _round_up(n, 8)
    n_pad = _round_up(n, tm)
    grid_m = n_pad // tm
    if n_pad > n:
        contrast = jnp.pad(contrast, ((0, n_pad - n), (0, 0)))

    temperature = float(temperature)

    if mask is None:
        # labels path (and SimCLR when labels is None -> each sample its own class).
        if labels is None:
            base_labels = jnp.arange(bsz, dtype=jnp.int32)
        else:
            labels = jnp.asarray(labels).reshape(-1)
            if labels.shape[0] != bsz:
                raise ValueError('Num of labels does not match num of features')
            base_labels = labels.astype(jnp.int32)
        tiled_labels = jnp.tile(base_labels, (n_views,))            # [n], view-major
        tiled_labels = jnp.pad(tiled_labels, (0, n_pad - n), constant_values=-1)
        lab_row = tiled_labels.reshape(n_pad, 1)
        lab_col = tiled_labels.reshape(1, n_pad)

        kernel = functools.partial(_supcon_labels_kernel, temperature, n)
        in_specs = [
            pl.BlockSpec((tm, 1), lambda i: (i, 0)),        # row labels block
            pl.BlockSpec((1, n_pad), lambda i: (0, 0)),     # all labels (resident)
            pl.BlockSpec((tm, dim), lambda i: (i, 0)),      # anchor row block
            pl.BlockSpec((n_pad, dim), lambda i: (0, 0)),   # full contrast (resident)
        ]
        operands = (lab_row, lab_col, contrast, contrast)
        streamed_mask_bytes = 0
    else:
        # Explicit (possibly asymmetric) mask: stream row blocks of the tiled mask.
        base_mask = jnp.asarray(mask).astype(jnp.float32)
        tiled_mask = jnp.tile(base_mask, (n_views, n_views))        # [n, n]
        tiled_mask = jnp.pad(tiled_mask, ((0, n_pad - n), (0, n_pad - n)))

        kernel = functools.partial(_supcon_mask_kernel, temperature, n)
        in_specs = [
            pl.BlockSpec((tm, n_pad), lambda i: (i, 0)),    # tiled mask row block
            pl.BlockSpec((tm, dim), lambda i: (i, 0)),      # anchor row block
            pl.BlockSpec((n_pad, dim), lambda i: (0, 0)),   # full contrast (resident)
        ]
        operands = (tiled_mask, contrast, contrast)
        streamed_mask_bytes = 2 * tm * n_pad * 4

    # Rough VMEM budget: resident A + double-buffered row blocks + live f32 temps.
    itemsize = jnp.dtype(compute_dtype).itemsize
    est = (n_pad * dim * itemsize           # resident contrast matrix
           + 2 * tm * dim * itemsize        # double-buffered anchor rows
           + 2 * tm * 4                     # output blocks
           + 6 * tm * n_pad * 4             # live [tm, Np] f32 temporaries
           + streamed_mask_bytes
           + 4 * n_pad)                     # labels
    vmem_limit = int(min(max(2 * est, 32 * 1024 * 1024), 48 * 1024 * 1024))

    cost = pl.CostEstimate(
        flops=2 * n_pad * n_pad * dim,
        transcendentals=n_pad * n_pad,
        bytes_accessed=int(2 * n_pad * dim * itemsize + streamed_mask_bytes * grid_m
                           + n_pad * 4))

    per_row = pl.pallas_call(
        kernel,
        out_shape=jax.ShapeDtypeStruct((n_pad, 1), jnp.float32),
        grid=(grid_m,),
        in_specs=in_specs,
        out_specs=pl.BlockSpec((tm, 1), lambda i: (i, 0)),
        compiler_params=pltpu.CompilerParams(
            dimension_semantics=("parallel",),
            vmem_limit_bytes=vmem_limit),
        cost_estimate=cost,
    )(*operands)

    # loss.view(anchor_count, batch_size).mean() == mean over all N anchor rows.
    return jnp.mean(per_row[:n, 0])


def _supcon_reference(features, labels=None, mask=None, temperature=0.07,
                      matmul_dtype=jnp.float32):
    """Pure-JAX reference mirroring the PyTorch code (contrast_mode='all')."""
    bsz, n_views, dim = features.shape
    if labels is None and mask is None:
        base = jnp.eye(bsz, dtype=jnp.float32)
    elif labels is not None:
        labels = labels.reshape(-1, 1)
        base = (labels == labels.T).astype(jnp.float32)
    else:
        base = mask.astype(jnp.float32)
    n = n_views * bsz
    cf = jnp.transpose(features, (1, 0, 2)).reshape(n, dim)
    cf_mm = cf.astype(matmul_dtype).astype(jnp.float32)
    adc = jnp.matmul(cf_mm, cf_mm.T) / temperature
    logits = adc - jnp.max(adc, axis=1, keepdims=True)
    m = jnp.tile(base, (n_views, n_views))
    lm = 1.0 - jnp.eye(n, dtype=jnp.float32)
    m = m * lm
    exp_logits = jnp.exp(logits) * lm
    log_prob = logits - jnp.log(jnp.sum(exp_logits, axis=1, keepdims=True))
    mlpp = jnp.sum(m * log_prob, axis=1) / jnp.sum(m, axis=1)
    return jnp.mean(-mlpp)


if __name__ == "__main__":
    key = jax.random.PRNGKey(0)
    k_feat, k_lab = jax.random.split(key)

    bsz, n_views, dim = 8, 2, 32
    feats = jax.random.normal(k_feat, (bsz, n_views, dim), dtype=jnp.float32)
    # L2-normalize per-row (typical SupCon usage; the module does not require it).
    feats = feats / jnp.linalg.norm(feats, axis=-1, keepdims=True)
    labels = jax.random.randint(k_lab, (bsz,), 0, 3, dtype=jnp.int32)

    loss = supcon_loss(feats, labels=labels, temperature=0.07)
    loss = jax.block_until_ready(loss)

    # Reference with the same bf16 feature quantization (tight tolerance) ...
    ref_bf16 = _supcon_reference(feats, labels=labels, temperature=0.07,
                                 matmul_dtype=jnp.bfloat16)
    assert jnp.allclose(loss, ref_bf16, rtol=1e-3, atol=1e-3), (loss, ref_bf16)
    # ... and the strict f32 reference (loose tolerance for the bf16 MXU feed).
    ref_f32 = _supcon_reference(feats, labels=labels, temperature=0.07,
                                matmul_dtype=jnp.float32)
    assert jnp.allclose(loss, ref_f32, rtol=5e-2, atol=5e-2), (loss, ref_f32)

    # Explicit-mask path should agree with the labels path for an equality mask.
    eq_mask = (labels.reshape(-1, 1) == labels.reshape(1, -1)).astype(jnp.float32)
    loss_mask = jax.block_until_ready(
        supcon_loss(feats, mask=eq_mask, temperature=0.07))
    assert jnp.allclose(loss, loss_mask, rtol=1e-5, atol=1e-5), (loss, loss_mask)

    print("KERNEL_OK")
</pallas_src>

<mosaic_0001>
module attributes {stable_mosaic.version = 11 : i64} {
  func.func @_supcon_labels_kernel(%arg0: i32, %arg1: memref<16x1xi32, #tpu.memory_space<vmem>>, %arg2: memref<1x16xi32, #tpu.memory_space<vmem>>, %arg3: memref<16x32xbf16, #tpu.memory_space<vmem>>, %arg4: memref<16x32xbf16, #tpu.memory_space<vmem>>, %arg5: memref<16x1xf32, #tpu.memory_space<vmem>>) attributes {dimension_semantics = [#tpu.dimension_semantics<parallel>], iteration_bounds = array<i64: 1>, scalar_prefetch = 0 : i64, scratch_operands = 0 : i64, tpu.core_type = #tpu.core_type<tc>, window_params = [{transform_indices = @transform_0, window_bounds = array<i64: 16, 1>}, {pipeline_mode = #tpu.pipeline_mode<synchronous>, transform_indices = @transform_1, window_bounds = array<i64: 1, 16>}, {transform_indices = @transform_2, window_bounds = array<i64: 16, 32>}, {pipeline_mode = #tpu.pipeline_mode<synchronous>, transform_indices = @transform_3, window_bounds = array<i64: 16, 32>}, {transform_indices = @transform_4, window_bounds = array<i64: 16, 1>}]} {
    %c0 = arith.constant 0 : index
    %c0_0 = arith.constant 0 : index
    %0 = vector.load %arg1[%c0, %c0_0] : memref<16x1xi32, #tpu.memory_space<vmem>>, vector<16x1xi32>
    %c0_1 = arith.constant 0 : index
    %c0_2 = arith.constant 0 : index
    %1 = vector.load %arg2[%c0_1, %c0_2] : memref<1x16xi32, #tpu.memory_space<vmem>>, vector<1x16xi32>
    %2 = vector.broadcast %0 : vector<16x1xi32> to vector<16x16xi32>
    %3 = vector.broadcast %1 : vector<1x16xi32> to vector<16x16xi32>
    %4 = arith.cmpi eq, %2, %3 : vector<16x16xi32>
    %cst = arith.constant 1.000000e+00 : f32
    %cst_3 = arith.constant 0.000000e+00 : f32
    %5 = vector.broadcast %cst : f32 to vector<16x16xf32>
    %6 = vector.broadcast %cst_3 : f32 to vector<16x16xf32>
    %7 = arith.select %4, %5, %6 : vector<16x16xi1>, vector<16x16xf32>
    %c0_4 = arith.constant 0 : index
    %c0_5 = arith.constant 0 : index
    %8 = vector.load %arg3[%c0_4, %c0_5] : memref<16x32xbf16, #tpu.memory_space<vmem>>, vector<16x32xbf16>
    %c0_6 = arith.constant 0 : index
    %c0_7 = arith.constant 0 : index
    %9 = vector.load %arg4[%c0_6, %c0_7] : memref<16x32xbf16, #tpu.memory_space<vmem>>, vector<16x32xbf16>
    %c16_i32 = arith.constant 16 : i32
    %10 = arith.muli %arg0, %c16_i32 : i32
    %cst_8 = arith.constant dense<0.000000e+00> : vector<16x16xf32>
    %11 = tpu.matmul %8, %9, %cst_8 {dimension_numbers = #tpu.dot_dimension_numbers<[1], [1], [0], [0], [0, 0, 1, 0], [], []>} : vector<16x32xbf16>, vector<16x32xbf16>, vector<16x16xf32> -> vector<16x16xf32>
    %cst_9 = arith.constant 14.2857141 : f32
    %12 = vector.broadcast %cst_9 : f32 to vector<16x16xf32>
    %13 = arith.mulf %11, %12 : vector<16x16xf32>
    %14 = tpu.iota {dimensions = array<i32: 1>} : vector<16x16xi32>
    %15 = tpu.iota {dimensions = array<i32: 0>} : vector<16x16xi32>
    %16 = vector.broadcast %10 : i32 to vector<16x16xi32>
    %17 = arith.addi %15, %16 : vector<16x16xi32>
    %c16_i32_10 = arith.constant 16 : i32
    %18 = vector.broadcast %c16_i32_10 : i32 to vector<16x16xi32>
    %19 = arith.cmpi slt, %14, %18 : vector<16x16xi32>
    %20 = arith.cmpi ne, %17, %14 : vector<16x16xi32>
    %21 = arith.andi %19, %20 : vector<16x16xi1>
    %cst_11 = arith.constant -1.000000e+30 : f32
    %22 = vector.broadcast %cst_11 : f32 to vector<16x16xf32>
    %23 = arith.select %19, %13, %22 : vector<16x16xi1>, vector<16x16xf32>
    %cst_12 = arith.constant dense<0xFF800000> : vector<16xf32>
    %24 = vector.multi_reduction <maximumf>, %23, %cst_12 [1] : vector<16x16xf32> to vector<16xf32>
    %25 = vector.shape_cast %24 : vector<16xf32> to vector<16x1xf32>
    %26 = vector.broadcast %25 : vector<16x1xf32> to vector<16x16xf32>
    %27 = arith.subf %13, %26 : vector<16x16xf32>
    %28 = math.exp %27 : vector<16x16xf32>
    %cst_13 = arith.constant 0.000000e+00 : f32
    %29 = vector.broadcast %cst_13 : f32 to vector<16x16xf32>
    %30 = arith.select %21, %28, %29 : vector<16x16xi1>, vector<16x16xf32>
    %cst_14 = arith.constant dense<0.000000e+00> : vector<16xf32>
    %31 = vector.multi_reduction <add>, %30, %cst_14 [1] : vector<16x16xf32> to vector<16xf32>
    %32 = vector.shape_cast %31 : vector<16xf32> to vector<16x1xf32>
    %33 = math.log %32 : vector<16x1xf32>
    %cst_15 = arith.constant 1.000000e+00 : f32
    %cst_16 = arith.constant 0.000000e+00 : f32
    %34 = vector.broadcast %cst_15 : f32 to vector<16x16xf32>
    %35 = vector.broadcast %cst_16 : f32 to vector<16x16xf32>
    %36 = arith.select %21, %34, %35 : vector<16x16xi1>, vector<16x16xf32>
    %37 = arith.mulf %7, %36 : vector<16x16xf32>
    %cst_17 = arith.constant dense<0.000000e+00> : vector<16xf32>
    %38 = vector.multi_reduction <add>, %37, %cst_17 [1] : vector<16x16xf32> to vector<16xf32>
    %39 = vector.shape_cast %38 : vector<16xf32> to vector<16x1xf32>
    %40 = arith.mulf %37, %27 : vector<16x16xf32>
    %cst_18 = arith.constant dense<0.000000e+00> : vector<16xf32>
    %41 = vector.multi_reduction <add>, %40, %cst_18 [1] : vector<16x16xf32> to vector<16xf32>
    %42 = vector.shape_cast %41 : vector<16xf32> to vector<16x1xf32>
    %43 = arith.mulf %33, %39 : vector<16x1xf32>
    %44 = arith.subf %42, %43 : vector<16x1xf32>
    %45 = arith.divf %44, %39 : vector<16x1xf32>
    %46 = tpu.iota {dimensions = array<i32: 0>} : vector<16x1xi32>
    %47 = vector.broadcast %10 : i32 to vector<16x1xi32>
    %48 = arith.addi %46, %47 : vector<16x1xi32>
    %c16_i32_19 = arith.constant 16 : i32
    %49 = vector.broadcast %c16_i32_19 : i32 to vector<16x1xi32>
    %50 = arith.cmpi slt, %48, %49 : vector<16x1xi32>
    %cst_20 = arith.constant 0.000000e+00 : f32
    %51 = vector.broadcast %cst_20 : f32 to vector<16x1xf32>
    %52 = arith.subf %51, %45 : vector<16x1xf32>
    %cst_21 = arith.constant 0.000000e+00 : f32
    %53 = vector.broadcast %cst_21 : f32 to vector<16x1xf32>
    %54 = arith.select %50, %52, %53 : vector<16x1xi1>, vector<16x1xf32>
    %c0_22 = arith.constant 0 : index
    %c0_23 = arith.constant 0 : index
    %55 = vector.load %arg5[%c0_22, %c0_23] : memref<16x1xf32, #tpu.memory_space<vmem>>, vector<16x1xf32>
    tpu.vector_store %arg5[%c0_22, %c0_23], %54 {strides = array<i32>} : memref<16x1xf32, #tpu.memory_space<vmem>>, vector<16x1xf32>,
    return
  }
  func.func @transform_0(%arg0: i32) -> (i32, i32) {
    %c0_i32 = arith.constant 0 : i32
    %c0_i32_0 = arith.constant 0 : i32
    return %arg0, %c0_i32 : i32, i32
  }
  func.func @transform_1(%arg0: i32) -> (i32, i32) {
    %c0_i32 = arith.constant 0 : i32
    %c0_i32_0 = arith.constant 0 : i32
    %c0_i32_1 = arith.constant 0 : i32
    return %c0_i32, %c0_i32_0 : i32, i32
  }
  func.func @transform_2(%arg0: i32) -> (i32, i32) {
    %c0_i32 = arith.constant 0 : i32
    %c0_i32_0 = arith.constant 0 : i32
    return %arg0, %c0_i32 : i32, i32
  }
  func.func @transform_3(%arg0: i32) -> (i32, i32) {
    %c0_i32 = arith.constant 0 : i32
    %c0_i32_0 = arith.constant 0 : i32
    %c0_i32_1 = arith.constant 0 : i32
    return %c0_i32, %c0_i32_0 : i32, i32
  }
  func.func @transform_4(%arg0: i32) -> (i32, i32) {
    %c0_i32 = arith.constant 0 : i32
    %c0_i32_0 = arith.constant 0 : i32
    return %arg0, %c0_i32 : i32, i32
  }
}

</mosaic_0001>

<bundles_post_ra>
// kernel: tpu_custom_call.1
= control target key start
LH: loop header
LB: loop body
LE: loop exit
PB: predicated region body
PF: predicated region fallthrough
CT: control target
= control target key end

     0   :  { %vm50_vm0 = vcmask 261120   ;;  %v210_v0 = vmov 0.0   ;;  %vm211_vm1 = vmmov 0   ;;  %v212_v4 = vmov 0   ;;  %s277_s3 = inlined_call_operand.vmem [shape: bf16[16,32], index: 3, kind: input, shape index: {}]   ;;  %s278_s2 = inlined_call_operand.vmem [shape: bf16[16,32], index: 2, kind: input, shape index: {}]   ;;  %s279_s0 = inlined_call_operand.vmem [shape: s32[16,1], index: 0, kind: input, shape index: {}]   ;;  %s280_s1 = inlined_call_operand.vmem [shape: s32[1,16], index: 1, kind: input, shape index: {}]   ;;  %s281_s4 = inlined_call_operand.vmem [shape: f32[16,1], index: 4, kind: output, shape index: {}]  }
   0x1   :  { %185 = vmatprep.subr.bf16.mxu0 %v210_v0  ;;  %v196_v1 = vld [vmem:[%s277_s3] sm:$0xff]   ;;  %187 = vmatprep.mubr.msk.bf16.mxu0 %vm211_vm1, %v210_v0  ;;  %v19_v6 = vld [vmem:[%s279_s0 + $0x8] sm:$0xff]  ;;  %v100_v7 = vlaneseq  ;;  %vm115_vm3 = vcmask 130048   ;;  %vm172_vm10 = vcmask 7168  }
   0x2   :  { %v55_v2 = vsel %vm50_vm0, %v196_v1, 0  ;;  %v197_v3 = vld [vmem:[%s278_s2] sm:$0xff]   ;;  %194 = vset.pattern.permute.xlu1 %v212_v4  ;;  %195 = vset.pattern.permute.xlu0 %v212_v4 }
   0x3   :  { %186 = vmatpush3.bf16.xpose.msra.mxu0 %v55_v2  ;;  %v18_v5 = vld [vmem:[%s279_s0] sm:$0xff]  ;;  %v101_v8 = vand.u32 127, %v100_v7  ;;  %v103_v25 = vshrl.u32 %v100_v7, 7 }
   0x4   :  { %22 = vperm.xlu1 %194, %v18_v5   ;;  %v179_v26 = vld [vmem:[%s280_s1] ss:$0 sm:$0xff] }
   0x5   :  { %vm108_vm2 = vcmp.lt.s32.totalorder %v101_v8, 16  ;;  %vm109_vm4 = vcmp.ne.s32.totalorder %v103_v25, %v101_v8  ;;  %v104_v28 = vadd.s32 8, %v103_v25 }
   0x6   :  { %vm111_vm6 = vmand %vm108_vm2, %vm109_vm4 }
   0x7   :  { %vm110_vm7 = vcmp.ne.s32.totalorder %v104_v28, %v101_v8  ;;  %v140_v31 = vsel %vm111_vm6, 1.0, %v210_v0 }
   0x8   :  { %25 = vperm.xlu1 %194, %v19_v6   ;;  %vm112_vm9 = vmand %vm108_vm2, %vm110_vm7 }
   0x9   :  { %v141_v40 = vsel %vm112_vm9, 1.0, %v210_v0 }
   0xa   :  { %188 = vmatmul.mubr.msk.bf16.vlgmr.msra.gmra.mxu0 %vm50_vm0, %v197_v3 }
  0x7f   :  { %v23_v27 = vpop.permute.xlu1 %22 }
  0x80   :  { %vm31_vm5 = vcmp.eq.s32.totalorder %v23_v27, %v179_v26 }
  0x81   :  { %v33_v29 = vsel %vm31_vm5, 1.0, %v210_v0 }
  0x82   :  { %v142_v35 = vmul.f32 %v140_v31, %v33_v29 }
  0x83   :  { %v26_v30 = vpop.permute.xlu1 %25 }
  0x84   :  { %vm32_vm8 = vcmp.eq.s32.totalorder %v26_v30, %v179_v26  ;;  %v144_v37 = vsel %vm115_vm3, %v142_v35, 0.0 }
  0x85   :  { %v34_v38 = vsel %vm32_vm8, 1.0, %v210_v0 }
  0x86   :  { %v143_v42 = vmul.f32 %v141_v40, %v34_v38 }
  0x88   :  { %v147_v43 = vsel %vm115_vm3, %v143_v42, 0.0 }
  0xca   :  { %v91_v9 = vpop.f32.mrf.mxu0 }
  0xcb   :  { %v98_v10 = vmul.f32 14.285714, %v91_v9 }
  0xcc   :  { %v189_v11 = vpop.f32.mrf.mxu0 }
  0xcd   :  { %v113_v12 = vsel %vm108_vm2, %v98_v10, -1e+30 }
  0xce   :  { %v94_v13 = vpop.f32.mrf.mxu0  ;;  %v116_v14 = vsel %vm115_vm3, %v113_v12, -inf }
  0xcf   :  { %v99_v15 = vmul.f32 14.285714, %v94_v13  ;;  %117 = vmax.xlane.f32.xlu0 %v116_v14 }
  0xd0   :  { %v190_v16 = vpop.f32.mrf.mxu0 }
  0xd1   :  { %v114_v17 = vsel %vm108_vm2, %v99_v15, -1e+30 }
  0xd2   :  { %v119_v18 = vsel %vm115_vm3, %v114_v17, -inf }
  0xd3   :  { %120 = vmax.xlane.f32.xlu0 %v119_v18 }
 0x158   :  { %v118_v19 = vpop.xlane.xlu0 %117 }
 0x159   :  { %v122_v20 = vsub.f32 %v98_v10, %v118_v19 }
 0x15b   :  { %v124_v21 = vmul.f32 1.442695, %v122_v20  ;;  %v150_v44 = vmul.f32 %v142_v35, %v122_v20 }
 0x15c   :  { %v121_v22 = vpop.xlane.xlu0 %120 }
 0x15d   :  { %198 = vpow2.f32 %v124_v21  ;;  %v123_v23 = vsub.f32 %v99_v15, %v121_v22  ;;  %v152_v45 = vsel %vm115_vm3, %v150_v44, 0.0 }
 0x15f   :  { %v126_v24 = vmul.f32 1.442695, %v123_v23  ;;  %v151_v46 = vmul.f32 %v143_v42, %v123_v23 }
 0x161   :  { %200 = vpow2.f32 %v126_v24  ;;  %v155_v47 = vsel %vm115_vm3, %v151_v46, 0.0 }
 0x16a   :  { %v199_v32 = vpop.eup %198 }
 0x16b   :  { %v128_v33 = vsel %vm111_vm6, %v199_v32, 0.0 }
 0x16c   :  { %v130_v34 = vsel %vm115_vm3, %v128_v33, 0.0 }
 0x16d   :  { %131 = vadd.xlane.f32.xlu0 %v130_v34 }
 0x16e   :  { %v201_v36 = vpop.eup %200 }
 0x16f   :  { %v129_v39 = vsel %vm112_vm9, %v201_v36, 0.0 }
 0x170   :  { %v133_v41 = vsel %vm115_vm3, %v129_v39, 0.0 }
 0x171   :  { %134 = vadd.xlane.f32.xlu1 %v133_v41  ;;  %145 = vadd.xlane.f32.xlu0 %v144_v37 }
 0x175   :  { %148 = vadd.xlane.f32.xlu0 %v147_v43 }
 0x179   :  { %153 = vadd.xlane.f32.xlu0 %v152_v45 }
 0x17d   :  { %156 = vadd.xlane.f32.xlu0 %v155_v47 }
 0x1f6   :  { %v132_v48 = vpop.xlane.xlu0 %131 }
 0x1f7   :  { %202 = vlog2.f32 %v132_v48 }
 0x1fa   :  { %v146_v49 = vpop.xlane.xlu0 %145  ;;  %v135_v50 = vpop.xlane.xlu1 %134 }
 0x1fb   :  { %204 = vrcp.f32 %v146_v49 }
 0x1fc   :  { %206 = vlog2.f32 %v135_v50 }
 0x1fe   :  { %v149_v51 = vpop.xlane.xlu0 %148 }
 0x1ff   :  { %208 = vrcp.f32 %v149_v51 }
 0x202   :  { %v154_v55 = vpop.xlane.xlu0 %153 }
 0x204   :  { %v203_v52 = vpop.eup %202 }
 0x205   :  { %v137_v53 = vmul.f32 0.6931472, %v203_v52 }
 0x206   :  { %v157_v63 = vpop.xlane.xlu0 %156 }
 0x207   :  { %v158_v54 = vmul.f32 %v146_v49, %v137_v53 }
 0x208   :  { %v205_v56 = vpop.eup %204 }
 0x209   :  { %v207_v57 = vpop.eup %206  ;;  %v160_v58 = vsub.f32 %v154_v55, %v158_v54 }
 0x20a   :  { %v139_v59 = vmul.f32 0.6931472, %v207_v57 }
 0x20b   :  { %v163_v60 = vmul.f32 %v205_v56, %v160_v58 }
 0x20c   :  { %v159_v61 = vmul.f32 %v149_v51, %v139_v59  ;;  %v209_v1 = vpop.eup %208 }
 0x20d   :  { %v168_v62 = vsub.f32 0.0, %v163_v60 }
 0x20e   :  { %v161_v0 = vsub.f32 %v157_v63, %v159_v61 }
 0x20f   :  { %173 = vst.msk [vmem:[%s281_s4] sm:$0xff] %vm172_vm10, %v168_v62 }
 0x210   :  { %v165_v2 = vmul.f32 %v209_v1, %v161_v0 }
 0x212   :  { %v169_v3 = vsub.f32 0.0, %v165_v2 }
 0x214   :  { %174 = vst.msk [vmem:[%s281_s4 + $0x8] sm:$0xff] %vm172_vm10, %v169_v3 }

</bundles_post_ra>
